<compile_context>
chip_gen: v7x
topology: tpu7x:2x2x1
jax: 0.10.0
libtpu: 0.0.40
codegen_flags: <defaults>
</compile_context>

<pallas_src>
import functools

import jax
import jax.numpy as jnp
from jax import lax
from jax.experimental import pallas as pl
from jax.experimental.pallas import tpu as pltpu


def _round_up(x: int, m: int) -> int:
    return (x + m - 1) // m * m


def _ffn_kernel(x_ref, w1_ref, b1_ref, w2_ref, b2_ref, o_ref, *scratch,
                dropout_p: float, base_seed: int, num_j: int, acc_in_out: bool):
    # x_ref:  (tm, d_model)      w1_ref: (tf, d_model)   b1_ref: (1, tf)
    # w2_ref: (d_model, tf)      b2_ref: (1, d_model)    o_ref: (tm, d_model)
    # scratch: optional (tm, d_model) f32 accumulator (bf16 output + tiled d_ff)
    j = pl.program_id(1)

    # h = relu(x @ W1^T + b1_tile) -- contract PyTorch-layout W1 (no transpose).
    # NOTE(v5e): the transposed-RHS contraction lowers to a fused MXU matmul;
    # no per-step XLU transpose of the weight tile.
    h = lax.dot_general(
        x_ref[...], w1_ref[...],
        dimension_numbers=(((1,), (1,)), ((), ())),
        preferred_element_type=jnp.float32,
    )
    h = jnp.maximum(h + b1_ref[...], 0.0)

    if dropout_p > 0.0:
        # Training-mode inverted dropout with the TPU hardware PRNG.
        # Mask is determined by (base_seed, i, j): vary `seed` across calls.
        # (Cannot bit-match torch RNG; the __main__ test runs dropout_p=0.0.)
        i = pl.program_id(0)
        pltpu.prng_seed(base_seed + i * num_j + j)
        bits = pltpu.bitcast(pltpu.prng_random_bits(h.shape), jnp.uint32)
        threshold = jnp.uint32(min(int(dropout_p * 4294967296.0), 4294967295))
        keep = bits >= threshold
        h = jnp.where(keep, h * (1.0 / (1.0 - dropout_p)), 0.0)

    # Second matmul: feed the MXU in the input dtype (native bf16 rate when the
    # model runs in bf16); accumulation stays f32 via preferred_element_type.
    partial = lax.dot_general(
        h.astype(x_ref.dtype), w2_ref[...],
        dimension_numbers=(((1,), (1,)), ((), ())),
        preferred_element_type=jnp.float32,
    )

    if num_j == 1:
        # d_ff fits in one tile: no cross-step accumulation at all.
        o_ref[...] = (partial + b2_ref[...]).astype(o_ref.dtype)
        return

    acc_ref = o_ref if acc_in_out else scratch[0]

    @pl.when(j == 0)
    def _():
        acc_ref[...] = partial            # overwrite: saves a zero store + add

    @pl.when(j > 0)
    def _():
        acc_ref[...] += partial

    @pl.when(j == num_j - 1)
    def _():
        if acc_in_out:
            o_ref[...] += b2_ref[...].astype(o_ref.dtype)
        else:
            o_ref[...] = (acc_ref[...] + b2_ref[...]).astype(o_ref.dtype)


@functools.partial(jax.jit, static_argnames=("tm", "tf", "dropout_p", "seed"))
def feed_forward_block(x, w1, b1, w2, b2, *, tm=256, tf=None,
                       dropout_p=0.0, seed=0):
    """x: (B, S, d_model); w1: (d_ff, d_model); b1: (d_ff,);
       w2: (d_model, d_ff); b2: (d_model,)  -- PyTorch nn.Linear layouts."""
    if not (0.0 <= float(dropout_p) < 1.0):
        raise ValueError("dropout_p must be in [0, 1)")

    B, S, d_model = x.shape
    d_ff = w1.shape[0]
    rows = B * S

    x_item = jnp.dtype(x.dtype).itemsize
    w_item = jnp.dtype(w1.dtype).itemsize
    out_item = x_item
    out_is_f32 = (jnp.dtype(x.dtype) == jnp.float32)

    # --- VMEM budget: handles v5e/v6e (128 MiB) vs v7x (64 MiB) automatically. ---
    try:
        info = pltpu.get_tpu_info()
        vmem_cap = int(getattr(info, "vmem_capacity_bytes", 0)) or (64 << 20)
    except Exception:
        vmem_cap = 64 << 20            # conservative fallback (v7x per-TC)
    budget = int(vmem_cap * 0.70)      # leave headroom for internal scratch

    # bf16 packs 16 rows per sublane-packed vreg; f32 needs 8-row granularity.
    rows_gran = 16 if x_item < 4 else 8

    def footprint(tm_, tf_, with_scratch):
        f = 2 * (tm_ * d_model * x_item          # x tile (double-buffered)
                 + tf_ * d_model * w_item        # W1 tile
                 + d_model * tf_ * w_item        # W2 tile
                 + tf_ * w_item                  # b1 tile
                 + d_model * w_item              # b2
                 + tm_ * d_model * out_item)     # out tile
        if with_scratch:
            f += tm_ * d_model * 4               # f32 accumulator
        return f

    # ---- Row tile: large, MXU/HBM friendly, clamped for small inputs. ----
    tm_req = max(rows_gran, _round_up(tm, rows_gran))
    tm_eff = min(tm_req, _round_up(rows, rows_gran))

    # ---- d_ff tile: prefer collapsing the reduction axis (weights DMA'd once). ----
    def pick_tf(tm_):
        if tf is not None:
            cands = [min(_round_up(tf, 128), d_ff)]
        else:
            cands = [d_ff] + [t for t in (2048, 1024, 512, 256, 128) if t < d_ff]
        for tf_c in cands:
            nj = -(-d_ff // tf_c)
            with_scratch = (nj > 1) and not out_is_f32
            if footprint(tm_, tf_c, with_scratch) <= budget:
                return tf_c, nj
        return None

    picked = pick_tf(tm_eff)
    if picked is not None and picked[1] > 1:
        # Weights get re-streamed per row tile: amortize with a bigger row tile.
        for tm_big in (1024, 512):
            tm_try = min(tm_big, _round_up(rows, rows_gran))
            if tm_try <= tm_eff:
                continue
            p2 = pick_tf(tm_try)
            if p2 is not None:
                tm_eff, picked = tm_try, p2
                break
    if picked is None:
        # Last resort: shrink the row tile until the smallest d_ff tile fits.
        while tm_eff > rows_gran and pick_tf(tm_eff) is None:
            tm_eff = max(rows_gran, _round_up(tm_eff // 2, rows_gran))
        picked = pick_tf(tm_eff)
        if picked is None:
            raise ValueError("FFN tiles do not fit in the VMEM budget")
    tf_eff, num_j = picked

    # ---- Megacore (v7x): keep >=2 row tiles on the 'parallel' axis when large. ----
    if rows // tm_eff < 2 and rows >= 2 * 256:
        tm_eff = _round_up(-(-rows // 2), rows_gran)

    rows_p = _round_up(rows, tm_eff)
    d_ff_p = _round_up(d_ff, tf_eff)
    n_row_tiles = rows_p // tm_eff
    grid = (n_row_tiles, num_j)

    acc_in_out = (num_j > 1) and out_is_f32
    use_scratch = (num_j > 1) and not out_is_f32

    # ---- Pad inputs (zero d_ff padding contributes nothing: relu(0)=0). ----
    x2d = x.reshape(rows, d_model)
    if rows_p != rows:
        x2d = jnp.pad(x2d, ((0, rows_p - rows), (0, 0)))
    w1p, b1p, w2p = w1, b1, w2
    if d_ff_p != d_ff:
        w1p = jnp.pad(w1, ((0, d_ff_p - d_ff), (0, 0)))
        b1p = jnp.pad(b1, (0, d_ff_p - d_ff))
        w2p = jnp.pad(w2, ((0, 0), (0, d_ff_p - d_ff)))
    b1_2d = b1p.reshape(1, d_ff_p)
    b2_2d = b2.reshape(1, d_model)

    # ---- Cost estimate with *real* DMA traffic (weight re-streaming). ----
    weight_reads = 1 if num_j == 1 else n_row_tiles
    cost = pl.CostEstimate(
        flops=4 * rows_p * d_model * d_ff_p,       # two matmuls
        transcendentals=0,
        bytes_accessed=int(
            rows_p * d_model * x_item                              # x
            + weight_reads * (2 * d_ff_p * d_model * w_item        # W1 + W2
                              + d_ff_p * w_item)                   # b1
            + d_model * w_item                                     # b2
            + rows_p * d_model * out_item                          # out
        ),
    )

    # ---- Scoped VMEM limit from the actual tile footprint (+30% headroom). ----
    fp = footprint(tm_eff, tf_eff, use_scratch)
    vmem_limit = max(16 << 20, min(int(fp * 1.3) + (2 << 20),
                                   int(vmem_cap * 0.92)))

    kernel = functools.partial(_ffn_kernel, dropout_p=float(dropout_p),
                               base_seed=int(seed), num_j=num_j,
                               acc_in_out=acc_in_out)

    out2d = pl.pallas_call(
        kernel,
        out_shape=jax.ShapeDtypeStruct((rows_p, d_model), x.dtype),
        grid_spec=pltpu.PrefetchScalarGridSpec(
            num_scalar_prefetch=0,
            grid=grid,
            in_specs=[
                pl.BlockSpec((tm_eff, d_model), lambda i, j: (i, 0)),   # x rows
                pl.BlockSpec((tf_eff, d_model), lambda i, j: (j, 0)),   # W1 tile
                pl.BlockSpec((1, tf_eff), lambda i, j: (0, j)),         # b1 tile
                pl.BlockSpec((d_model, tf_eff), lambda i, j: (0, j)),   # W2 tile
                pl.BlockSpec((1, d_model), lambda i, j: (0, 0)),        # b2
            ],
            out_specs=pl.BlockSpec((tm_eff, d_model), lambda i, j: (i, 0)),
            scratch_shapes=([pltpu.VMEM((tm_eff, d_model), jnp.float32)]
                            if use_scratch else []),
        ),
        compiler_params=pltpu.CompilerParams(
            dimension_semantics=("parallel", "arbitrary"),
            vmem_limit_bytes=vmem_limit,
        ),
        cost_estimate=cost,
    )(x2d, w1p, b1_2d, w2p, b2_2d)

    return out2d[:rows].reshape(B, S, d_model)


if __name__ == "__main__":
    # Small shapes consistent with the module: (batch, seq, d_model) -> same shape.
    batch, seq, d_model, d_ff = 2, 8, 32, 128

    key = jax.random.PRNGKey(0)
    kx, kw1, kb1, kw2, kb2 = jax.random.split(key, 5)

    x = jax.random.normal(kx, (batch, seq, d_model), dtype=jnp.float32)

    # nn.Linear-style uniform(-1/sqrt(fan_in), 1/sqrt(fan_in)) init, PyTorch layouts.
    bound1 = 1.0 / (d_model ** 0.5)
    w1 = jax.random.uniform(kw1, (d_ff, d_model), minval=-bound1, maxval=bound1,
                            dtype=jnp.float32)
    b1 = jax.random.uniform(kb1, (d_ff,), minval=-bound1, maxval=bound1,
                            dtype=jnp.float32)
    bound2 = 1.0 / (d_ff ** 0.5)
    w2 = jax.random.uniform(kw2, (d_model, d_ff), minval=-bound2, maxval=bound2,
                            dtype=jnp.float32)
    b2 = jax.random.uniform(kb2, (d_model,), minval=-bound2, maxval=bound2,
                            dtype=jnp.float32)

    # dropout_p=0.0 == eval-mode dropout (identity), so the check is deterministic.
    out = feed_forward_block(x, w1, b1, w2, b2, dropout_p=0.0)
    out = jax.block_until_ready(out)

    # Pure-JAX reference of the PyTorch forward.
    h_ref = jnp.maximum(x @ w1.T + b1, 0.0)
    ref = h_ref @ w2.T + b2

    assert out.shape == (batch, seq, d_model)
    assert jnp.allclose(out, ref, atol=1e-4, rtol=1e-4), "mismatch vs reference"

    print("KERNEL_OK")
</pallas_src>

<mosaic_0001>
module attributes {stable_mosaic.version = 11 : i64} {
  func.func @_ffn_kernel(%arg0: i32, %arg1: i32, %arg2: memref<16x32xf32, #tpu.memory_space<vmem>>, %arg3: memref<128x32xf32, #tpu.memory_space<vmem>>, %arg4: memref<1x128xf32, #tpu.memory_space<vmem>>, %arg5: memref<32x128xf32, #tpu.memory_space<vmem>>, %arg6: memref<1x32xf32, #tpu.memory_space<vmem>>, %arg7: memref<16x32xf32, #tpu.memory_space<vmem>>) attributes {dimension_semantics = [#tpu.dimension_semantics<parallel>, #tpu.dimension_semantics<arbitrary>], iteration_bounds = array<i64: 1, 1>, scalar_prefetch = 0 : i64, scratch_operands = 0 : i64, tpu.core_type = #tpu.core_type<tc>, window_params = [{transform_indices = @transform_0, window_bounds = array<i64: 16, 32>}, {transform_indices = @transform_1, window_bounds = array<i64: 128, 32>}, {transform_indices = @transform_2, window_bounds = array<i64: 1, 128>}, {transform_indices = @transform_3, window_bounds = array<i64: 32, 128>}, {pipeline_mode = #tpu.pipeline_mode<synchronous>, transform_indices = @transform_4, window_bounds = array<i64: 1, 32>}, {transform_indices = @transform_5, window_bounds = array<i64: 16, 32>}]} {
    %c0 = arith.constant 0 : index
    %c0_0 = arith.constant 0 : index
    %0 = vector.load %arg2[%c0, %c0_0] : memref<16x32xf32, #tpu.memory_space<vmem>>, vector<16x32xf32>
    %c0_1 = arith.constant 0 : index
    %c0_2 = arith.constant 0 : index
    %1 = vector.load %arg3[%c0_1, %c0_2] : memref<128x32xf32, #tpu.memory_space<vmem>>, vector<128x32xf32>
    %cst = arith.constant dense<0.000000e+00> : vector<16x128xf32>
    %2 = tpu.matmul %0, %1, %cst {dimension_numbers = #tpu.dot_dimension_numbers<[1], [1], [0], [0], [0, 0, 1, 0], [], []>} : vector<16x32xf32>, vector<128x32xf32>, vector<16x128xf32> -> vector<16x128xf32>
    %c0_3 = arith.constant 0 : index
    %c0_4 = arith.constant 0 : index
    %3 = vector.load %arg4[%c0_3, %c0_4] : memref<1x128xf32, #tpu.memory_space<vmem>>, vector<1x128xf32>
    %4 = vector.broadcast %3 : vector<1x128xf32> to vector<16x128xf32>
    %5 = arith.addf %2, %4 : vector<16x128xf32>
    %cst_5 = arith.constant 0.000000e+00 : f32
    %6 = vector.broadcast %cst_5 : f32 to vector<16x128xf32>
    %7 = arith.maximumf %5, %6 : vector<16x128xf32>
    %c0_6 = arith.constant 0 : index
    %c0_7 = arith.constant 0 : index
    %8 = vector.load %arg5[%c0_6, %c0_7] : memref<32x128xf32, #tpu.memory_space<vmem>>, vector<32x128xf32>
    %cst_8 = arith.constant dense<0.000000e+00> : vector<16x32xf32>
    %9 = tpu.matmul %7, %8, %cst_8 {dimension_numbers = #tpu.dot_dimension_numbers<[1], [1], [0], [0], [0, 0, 1, 0], [], []>} : vector<16x128xf32>, vector<32x128xf32>, vector<16x32xf32> -> vector<16x32xf32>
    %c0_9 = arith.constant 0 : index
    %c0_10 = arith.constant 0 : index
    %10 = vector.load %arg6[%c0_9, %c0_10] : memref<1x32xf32, #tpu.memory_space<vmem>>, vector<1x32xf32>
    %11 = vector.broadcast %10 : vector<1x32xf32> to vector<16x32xf32>
    %12 = arith.addf %9, %11 : vector<16x32xf32>
    %c0_11 = arith.constant 0 : index
    %c0_12 = arith.constant 0 : index
    %13 = vector.load %arg7[%c0_11, %c0_12] : memref<16x32xf32, #tpu.memory_space<vmem>>, vector<16x32xf32>
    tpu.vector_store %arg7[%c0_11, %c0_12], %12 {strides = array<i32>} : memref<16x32xf32, #tpu.memory_space<vmem>>, vector<16x32xf32>,
    return
  }
  func.func @transform_0(%arg0: i32, %arg1: i32) -> (i32, i32) {
    %c0_i32 = arith.constant 0 : i32
    %c0_i32_0 = arith.constant 0 : i32
    return %arg0, %c0_i32 : i32, i32
  }
  func.func @transform_1(%arg0: i32, %arg1: i32) -> (i32, i32) {
    %c0_i32 = arith.constant 0 : i32
    %c0_i32_0 = arith.constant 0 : i32
    return %arg1, %c0_i32 : i32, i32
  }
  func.func @transform_2(%arg0: i32, %arg1: i32) -> (i32, i32) {
    %c0_i32 = arith.constant 0 : i32
    %c0_i32_0 = arith.constant 0 : i32
    return %c0_i32, %arg1 : i32, i32
  }
  func.func @transform_3(%arg0: i32, %arg1: i32) -> (i32, i32) {
    %c0_i32 = arith.constant 0 : i32
    %c0_i32_0 = arith.constant 0 : i32
    return %c0_i32, %arg1 : i32, i32
  }
  func.func @transform_4(%arg0: i32, %arg1: i32) -> (i32, i32) {
    %c0_i32 = arith.constant 0 : i32
    %c0_i32_0 = arith.constant 0 : i32
    %c0_i32_1 = arith.constant 0 : i32
    return %c0_i32, %c0_i32_0 : i32, i32
  }
  func.func @transform_5(%arg0: i32, %arg1: i32) -> (i32, i32) {
    %c0_i32 = arith.constant 0 : i32
    %c0_i32_0 = arith.constant 0 : i32
    return %arg0, %c0_i32 : i32, i32
  }
}

</mosaic_0001>

<bundles_post_ra>
// kernel: feed_forward_block.1
= control target key start
LH: loop header
LB: loop body
LE: loop exit
PB: predicated region body
PF: predicated region fallthrough
CT: control target
= control target key end

     0   :  { %vm46_vm0 = vcmask 261120   ;;  %s614_s0 = inlined_call_operand.vmem [shape: f32[16,32], index: 0, kind: input, shape index: {}]   ;;  %s615_s1 = inlined_call_operand.vmem [shape: f32[128,32], index: 1, kind: input, shape index: {}]   ;;  %s616_s2 = inlined_call_operand.vmem [shape: f32[1,128], index: 2, kind: input, shape index: {}]   ;;  %s617_s3 = inlined_call_operand.vmem [shape: f32[32,128], index: 3, kind: input, shape index: {}]   ;;  %s618_s4 = inlined_call_operand.vmem [shape: f32[1,32], index: 4, kind: input, shape index: {}]   ;;  %s619_s5 = inlined_call_operand.hbm [shape: f32[16,32], index: 5, kind: output, shape index: {}]  }
   0x1   :  { %v23_v0 = vld [vmem:[%s615_s1] sm:$0xff]  ;;  %v24_v1 = vld [vmem:[%s615_s1 + $0x8] sm:$0xff]  ;;  %v25_v2 = vld [vmem:[%s615_s1 + $0x10] sm:$0xff] }
   0x2   :  { %v372_v3 = vpack.c.bf16 %v24_v1, %v23_v0  ;;  %vm499_vm1 = vmpackc.low %vm46_vm0, %vm46_vm0  ;;  %v26_v5 = vld [vmem:[%s615_s1 + $0x18] sm:$0xff]  ;;  %v27_v7 = vld [vmem:[%s615_s1 + $0x20] sm:$0xff] }
   0x3   :  { %v378_v6 = vpack.c.bf16 %v26_v5, %v25_v2  ;;  %v21_v8 = vld [vmem:[%s614_s0] sm:$0xff]  ;;  %v28_v9 = vld [vmem:[%s615_s1 + $0x28] sm:$0xff]  ;;  %v180_v13 = vld [vmem:[%s617_s3 + $0x10] sm:$0xff] }
   0x4   :  { %374 = vmatprep.subr.msk.bf16.mxu0 %vm499_vm1, %v372_v3  ;;  %358 = vmatprep.mubr.msk.f32.mxu0 %vm46_vm0, %v21_v8  ;;  %v178_v10 = vld [vmem:[%s617_s3] sm:$0xff]  ;;  %v179_v11 = vld [vmem:[%s617_s3 + $0x8] sm:$0xff]  ;;  %v181_v14 = vld [vmem:[%s617_s3 + $0x18] sm:$0xff] }
   0x5   :  { %377 = vmatpush3.bf16.xpose.msk.msra.mxu0 %vm499_vm1, %v372_v3  ;;  %v420_v12 = vpack.c.bf16 %v179_v11, %v178_v10 }
   0x6   :  { %380 = vmatprep.subr.msk.bf16.mxu0 %vm499_vm1, %v378_v6 }
   0x7   :  { %10 = vsyncpa [#allocation3], 0  ;;  %v424_v15 = vpack.c.bf16 %v181_v14, %v180_v13  ;;  %v384_v16 = vpack.c.bf16 %v28_v9, %v27_v7  ;;  %421 = vmatprep.subr.bf16.mxu1 %v420_v12  ;;  %v29_v17 = vld [vmem:[%s615_s1 + $0x30] sm:$0xff]  ;;  %v30_v18 = vld [vmem:[%s615_s1 + $0x38] sm:$0xff]  ;;  %s455_s14 = smov [#allocation2]  }
   0x8   :  { %423 = vmatpush3.bf16.xpose.msra.mxu1 %v420_v12  ;;  %v390_v19 = vpack.c.bf16 %v30_v18, %v29_v17  ;;  %v31_v20 = vld [vmem:[%s615_s1 + $0x40] sm:$0xff]  ;;  %v32_v21 = vld [vmem:[%s615_s1 + $0x48] sm:$0xff]  ;;  %v33_v23 = vld [vmem:[%s615_s1 + $0x50] sm:$0xff] }
   0x9   :  { %425 = vmatprep.subr.bf16.mxu1 %v424_v15  ;;  %v396_v22 = vpack.c.bf16 %v32_v21, %v31_v20  ;;  %v34_v24 = vld [vmem:[%s615_s1 + $0x58] sm:$0xff]  ;;  %v35_v26 = vld [vmem:[%s615_s1 + $0x60] sm:$0xff]  ;;  %v36_v27 = vld [vmem:[%s615_s1 + $0x68] sm:$0xff] }
   0xa   :  { %v402_v25 = vpack.c.bf16 %v34_v24, %v33_v23  ;;  %v408_v28 = vpack.c.bf16 %v36_v27, %v35_v26  ;;  %v37_v29 = vld [vmem:[%s615_s1 + $0x70] sm:$0xff]  ;;  %v38_v30 = vld [vmem:[%s615_s1 + $0x78] sm:$0xff]  ;;  %v22_v32 = vld [vmem:[%s614_s0 + $0x8] sm:$0xff]  ;;  %s271_s0 = sshll.u32 %s455_s14, 4  ;;  %s272_s0 = int_to_ptr.vmem [resolvable:$true] %s271_s0 }
   0xb   :  { %v414_v31 = vpack.c.bf16 %v38_v30, %v37_v29  ;;  %v282_v33 = vld [vmem:[%s616_s2] ss:$0 sm:$0xff]  ;;  %s431_s2 = scalar_lea.vmem %s272_s0, 256  ;;  %p436_p1 = scmp.lt.s32.totalorder %s272_s0, %s272_s0 }
   0xc   :  { %v301_v40 = vld [vmem:[%s618_s4] ss:$0 sm:$0xff]  ;;  %p432_p0 = scmp.ne.s32.totalorder %s272_s0, %s431_s2  ;;  %p437_p2 = scmp.lt.s32.totalorder %s431_s2, %s431_s2 }
   0xd   :  { %383 = vmatpush3.bf16.xpose.msk.msra.mxu0 %vm499_vm1, %v378_v6 }
   0xe   :  { %386 = vmatprep.subr.msk.bf16.mxu0 %vm499_vm1, %v384_v16  ;;  %p438_p3 = por %p437_p2, %p436_p1 }
  0x10   :  { %427 = vmatpush3.bf16.xpose.msra.mxu1 %v424_v15  ;;  %p439_p4 = pnand %p438_p3, %p432_p0 }
  0x15   :  { %389 = vmatpush3.bf16.xpose.msk.msra.mxu0 %vm499_vm1, %v384_v16 }
  0x16   :  { %392 = vmatprep.subr.msk.bf16.mxu0 %vm499_vm1, %v390_v19 }
  0x1d   :  { %395 = vmatpush3.bf16.xpose.msk.msra.mxu0 %vm499_vm1, %v390_v19 }
  0x1e   :  { %398 = vmatprep.subr.msk.bf16.mxu0 %vm499_vm1, %v396_v22 }
  0x25   :  { %401 = vmatpush3.bf16.xpose.msk.msra.mxu0 %vm499_vm1, %v396_v22 }
  0x26   :  { %404 = vmatprep.subr.msk.bf16.mxu0 %vm499_vm1, %v402_v25 }
  0x2d   :  { %407 = vmatpush3.bf16.xpose.msk.msra.mxu0 %vm499_vm1, %v402_v25 }
  0x2e   :  { %410 = vmatprep.subr.msk.bf16.mxu0 %vm499_vm1, %v408_v28 }
  0x35   :  { %413 = vmatpush3.bf16.xpose.msk.msra.mxu0 %vm499_vm1, %v408_v28 }
  0x36   :  { %416 = vmatprep.subr.msk.bf16.mxu0 %vm499_vm1, %v414_v31 }
  0x3d   :  { %419 = vmatpush3.bf16.xpose.msk.msra.mxu0 %vm499_vm1, %v414_v31 }
  0x44   :  { %359 = vmatmul.mubr.msk.f32.vlgmr.msra.gmra.mrb[0].mxu0 %vm46_vm0, %v22_v32 }
 0x117   :  { %v360_v34 = vpop.f32.mrb[0].mxu0 }
 0x118   :  { %v173_v35 = vadd.f32 %v360_v34, %v282_v33  ;;  %v167_v36 = vpop.f32.mrb[1].mxu0 }
 0x119   :  { %v168_v37 = vadd.f32 %v282_v33, %v167_v36 }
 0x11a   :  { %v177_v39 = vmax.f32 %v173_v35, 0.0 }
 0x11b   :  { %v176_v38 = vmax.f32 %v168_v37, 0.0 }
 0x11d   :  { %369 = vmatprep.mubr.f32.mxu1 %v176_v38 }
 0x11e   :  { %370 = vmatmul.mubr.f32.vlgmr.msra.gmra.mrb[0].mxu1 %v177_v39 }
 0x1f1   :  { %v371_v41 = vpop.f32.mrb[0].mxu1 }
 0x1f2   :  { %v261_v42 = vadd.f32 %v371_v41, %v301_v40  ;;  %v255_v43 = vpop.f32.mrb[1].mxu1 }
 0x1f3   :  { %v256_v44 = vadd.f32 %v301_v40, %v255_v43 }
 0x1f4   :  { %265 = vst.msk [vmem:[#allocation2 + $0x8] sm:$0xff] %vm46_vm0, %v261_v42 }
 0x1f5   :  { %264 = vst.msk [vmem:[#allocation2] sm:$0xff] %vm46_vm0, %v256_v44 }
 0x1f6   :  { %442 = shalt.err (!%p439_p4)
}
 0x1f7   :  { %s443_s16 = scalar_lea.hbm %s619_s5, 256 }
 0x1f8   :  { %p444_p5 = scmp.ne.s32.totalorder %s619_s5, %s443_s16  ;;  %p447_p6 = scmp.lt.u32.totalorder %s443_s16, %s619_s5 }
 0x1fa   :  { %p449_p7 = pnand %p447_p6, %p444_p5 }
 0x1fc   :  { %452 = shalt.err (!%p449_p7)
}
 0x1fd   :  { %s456_s20 = smov 128   ;;  %s457_s21 = smov 8  }
 0x1fe   :  { %277 = dma.vmem_to_hbm [thread:$0]  %s272_s0, 256, %s619_s5, [#allocation3], %s456_s20, %s456_s20, %s457_s21  }
 0x1ff   :  { %453 = dma.done.wait [#allocation3], 256  }
 0x200   :  { %454 = vsyncadd [#allocation3], 4294967040 }
 0x201   :  { %281 = vsyncpa [#allocation3], 1 }

</bundles_post_ra>
